<compile_context>
chip_gen: v7x
topology: tpu7x:2x2x1
jax: 0.10.0
libtpu: 0.0.40
codegen_flags: <defaults>
</compile_context>

<pallas_src>
import numpy as np
import jax
import jax.numpy as jnp
from jax.experimental import pallas as pl
from jax.experimental.pallas import tpu as pltpu

CHAR_EMBEDDING_DIM = 50
CHAR_LSTM_HIDDEN_DIM = 50

char_to_idx = {char: i for i, char in enumerate(
    'abcdefghijklmnopqrstuvwxyzABCDEFGHIJKLMNOPQRSTUVWXYZ0123456789'
    'áàảạãăằẳẵặâầẩẫậéèẻẹẽêềểễệíìỉịĩóòỏọõôồổỗộơờởỡợúùủụũưừửữựýỳỷỵỹđĐ'
    ',.:;?!\'"()[]{}<>/-_&@#$%^&*=+~` ')}
CHAR_VOCAB_SIZE = len(char_to_idx)

E = CHAR_EMBEDDING_DIM
H = CHAR_LSTM_HIDDEN_DIM
EP = 64            # embedding dim padded to a sublane-friendly contraction width
HP = 64            # hidden padded to the gate slot width
G = 4 * HP         # fused gate width per direction (i|f|g|o, each 64 wide)


def _round_up(x, m):
    return ((x + m - 1) // m) * m


def bilstm_kernel(tmax_ref,                        # scalar prefetch: per-tile max len
                  x_ref, lens_ref,
                  wihf_ref, wihb_ref, whhf_ref, whhb_ref, bf_ref, bb_ref,
                  out_ref):
    L, TW, _ = x_ref.shape

    lens = lens_ref[...]                           # (TW, 1) int32
    t_max = tmax_ref[pl.program_id(0)]             # serial trip count for this tile

    bf = bf_ref[...]                               # (1, G) -- small, hoisted
    bb = bb_ref[...]

    def sigm(z):
        # sigmoid via tanh: keeps the work on the EUP slot, no vector divide
        return 0.5 * jnp.tanh(0.5 * z) + 0.5

    def gates(pre, c):
        i = sigm(pre[:, 0 * HP:1 * HP])
        f = sigm(pre[:, 1 * HP:2 * HP])
        g = jnp.tanh(pre[:, 2 * HP:3 * HP])
        o = sigm(pre[:, 3 * HP:4 * HP])
        c_new = f * c + i * g
        h_new = o * jnp.tanh(c_new)
        return h_new, c_new

    def body(s, carry):
        hf, cf, hb, cb = carry
        t_b = t_max - 1 - s

        xf = x_ref[s]                              # (TW, 64)
        xb = x_ref[t_b]

        # input projection done in-loop (bounded by t_max); MXU has slack,
        # and this avoids any big xp scratch store/load.
        pre_f = (jnp.dot(xf, wihf_ref[...], preferred_element_type=jnp.float32)
                 + jnp.dot(hf, whhf_ref[...], preferred_element_type=jnp.float32)
                 + bf)
        pre_b = (jnp.dot(xb, wihb_ref[...], preferred_element_type=jnp.float32)
                 + jnp.dot(hb, whhb_ref[...], preferred_element_type=jnp.float32)
                 + bb)

        hf_n, cf_n = gates(pre_f, cf)
        hb_n, cb_n = gates(pre_b, cb)

        mf = s < lens                              # (TW, 1) bool
        mb = t_b < lens
        return (jnp.where(mf, hf_n, hf), jnp.where(mf, cf_n, cf),
                jnp.where(mb, hb_n, hb), jnp.where(mb, cb_n, cb))

    z = jnp.zeros((TW, HP), jnp.float32)
    hf, cf, hb, cb = jax.lax.fori_loop(0, t_max, body, (z, z, z, z))

    # lane-dense 128-wide output store: [fwd padded | bwd padded]
    out_ref[...] = jnp.concatenate([hf, hb], axis=1)


def _pack_weights(params):
    """Pack per-gate weights into lane-padded fused slabs (gate order i,f,g,o)."""
    def pack(w, rows):                             # (4, r_in, H) -> (rows, G)
        out = jnp.zeros((rows, G), jnp.float32)
        for k in range(4):
            out = out.at[:w.shape[1], k * HP:k * HP + H].set(w[k])
        return out

    def pack_b(b):                                 # (4, 1, H) -> (1, G)
        v = jnp.zeros((1, G), jnp.float32)
        for k in range(4):
            v = v.at[:, k * HP:k * HP + H].set(b[k])
        return v

    wihf = pack(params["wih_f"], EP)               # (64, 256), rows 50..63 zero
    wihb = pack(params["wih_b"], EP)
    whhf = pack(params["whh_f"], HP)               # (64, 256)
    whhb = pack(params["whh_b"], HP)
    bf = pack_b(params["b_f"])                     # (1, 256)
    bb = pack_b(params["b_b"])
    return wihf, wihb, whhf, whhb, bf, bb


def char_bilstm_embed(char_idx_padded, lens, params, *, tw=None):
    """char_idx_padded: (W, L) int32, lens: (W,) int32 -> (W, 2H) float32."""
    Wn, L = char_idx_padded.shape
    if Wn == 0:
        return jnp.zeros((0, 2 * H), jnp.float32)

    lens = lens.astype(jnp.int32)

    # word tile: multiple of 8 sublanes; 128 keeps tiles length-homogeneous
    if tw is None:
        tw = min(128, _round_up(Wn, 8))
    tw = max(8, _round_up(tw, 8))
    Wp = _round_up(Wn, tw)
    n_tiles = Wp // tw

    # pad the word dimension, then SORT ascending by length so each tile's
    # t_max hugs the true lengths inside it (all-zero padding words land in
    # the shortest tile and cost ~nothing).
    lens_p = jnp.pad(lens, (0, Wp - Wn))
    idx_p = jnp.pad(char_idx_padded.astype(jnp.int32), ((0, Wp - Wn), (0, 0)))
    sort_perm = jnp.argsort(lens_p)                                # (Wp,)

    # static zig-zag tile reorder: pair shortest tiles with longest so the
    # "parallel" grid axis is balanced across v7x's two TensorCores.
    half = (n_tiles + 1) // 2
    tp = np.empty(n_tiles, dtype=np.int64)
    tp[0::2] = np.arange(half)
    tp[1::2] = np.arange(n_tiles - 1, half - 1, -1)
    word_perm = sort_perm.reshape(n_tiles, tw)[tp].reshape(Wp)

    lens_s = lens_p[word_perm]
    idx_s = idx_p[word_perm]
    tile_max = jnp.max(lens_s.reshape(n_tiles, tw), axis=1).astype(jnp.int32)

    # glue: embedding gather (E padded to 64 zero cols) + time-major transpose
    emb_p = jnp.pad(params["emb"].astype(jnp.float32), ((0, 0), (0, EP - E)))
    x = jnp.transpose(emb_p[idx_s], (1, 0, 2))                     # (L, Wp, 64)
    lens2 = lens_s.reshape(Wp, 1)

    wihf, wihb, whhf, whhb, bf, bb = _pack_weights(params)

    out_s = pl.pallas_call(
        bilstm_kernel,
        out_shape=jax.ShapeDtypeStruct((Wp, 2 * HP), jnp.float32),
        grid_spec=pltpu.PrefetchScalarGridSpec(
            num_scalar_prefetch=1,
            grid=(n_tiles,),
            in_specs=[
                pl.BlockSpec((L, tw, EP), lambda i, tm: (0, i, 0)),
                pl.BlockSpec((tw, 1), lambda i, tm: (i, 0)),
                pl.BlockSpec((EP, G), lambda i, tm: (0, 0)),
                pl.BlockSpec((EP, G), lambda i, tm: (0, 0)),
                pl.BlockSpec((HP, G), lambda i, tm: (0, 0)),
                pl.BlockSpec((HP, G), lambda i, tm: (0, 0)),
                pl.BlockSpec((1, G), lambda i, tm: (0, 0)),
                pl.BlockSpec((1, G), lambda i, tm: (0, 0)),
            ],
            out_specs=pl.BlockSpec((tw, 2 * HP), lambda i, tm: (i, 0)),
        ),
        compiler_params=pltpu.CompilerParams(
            dimension_semantics=("parallel",),
            vmem_limit_bytes=48 * 1024 * 1024),     # headroom under v7x's 64 MiB/TC
    )(tile_max, x, lens2, wihf, wihb, whhf, whhb, bf, bb)

    # invert the word permutation, then slice valid lanes:
    # fwd hidden in cols [0:H], bwd hidden in cols [HP:HP+H]
    out_full = jnp.zeros((Wp, 2 * HP), jnp.float32).at[word_perm].set(out_s)
    return jnp.concatenate([out_full[:Wn, 0:H], out_full[:Wn, HP:HP + H]], axis=1)


def make_params(key):
    ks = jax.random.split(key, 7)
    bound = 1.0 / np.sqrt(H)
    # TODO(synk): '<PAD>' is not a key of char_to_idx (module __init__ would KeyError);
    # no embedding row is zeroed here; padded timesteps are masked via lens instead.
    emb = jax.random.normal(ks[0], (CHAR_VOCAB_SIZE, E), dtype=jnp.float32) * 0.1
    u = lambda k, shape: jax.random.uniform(k, shape, jnp.float32, -bound, bound)
    return {
        "emb": emb,
        "wih_f": u(ks[1], (4, E, H)),
        "whh_f": u(ks[2], (4, H, H)),
        "b_f": u(ks[3], (4, 1, H)),     # combined b_ih + b_hh
        "wih_b": u(ks[4], (4, E, H)),
        "whh_b": u(ks[5], (4, H, H)),
        "b_b": u(ks[6], (4, 1, H)),
    }


def _np_sigmoid(x):
    return 1.0 / (1.0 + np.exp(-x))


def reference(char_idx_padded, lens, params):
    """Pure numpy replica of the per-word PyTorch forward (for verification)."""
    emb = np.asarray(params["emb"])
    wih_f, whh_f, b_f = map(np.asarray, (params["wih_f"], params["whh_f"], params["b_f"]))
    wih_b, whh_b, b_b = map(np.asarray, (params["wih_b"], params["whh_b"], params["b_b"]))

    def run_dir(x_seq, wih, whh, b):
        h = np.zeros(H, np.float32)
        c = np.zeros(H, np.float32)
        for t in range(x_seq.shape[0]):
            pre = [x_seq[t] @ wih[k] + h @ whh[k] + b[k, 0] for k in range(4)]
            i = _np_sigmoid(pre[0]); f = _np_sigmoid(pre[1])
            g = np.tanh(pre[2]); o = _np_sigmoid(pre[3])
            c = f * c + i * g
            h = o * np.tanh(c)
        return h

    outs = []
    for w in range(char_idx_padded.shape[0]):
        n = int(lens[w])
        if n == 0:
            outs.append(np.zeros(2 * H, np.float32))
            continue
        x = emb[np.asarray(char_idx_padded)[w, :n]].astype(np.float32)  # (n, E)
        hf = run_dir(x, wih_f, whh_f, b_f)
        hb = run_dir(x[::-1], wih_b, whh_b, b_b)
        outs.append(np.concatenate([hf, hb]))
    return np.stack(outs)


if __name__ == "__main__":
    key = jax.random.PRNGKey(0)
    params = make_params(key)

    # ---- test 1: small word list with an empty word (zero-output path) ----
    words = ["hello", "world", "ai", ""]
    seqs = [np.array([char_to_idx[c] for c in w], dtype=np.int32) for w in words]
    Wn = len(seqs)
    L = max(max((len(s) for s in seqs), default=1), 1)
    char_idx_padded = np.zeros((Wn, L), dtype=np.int32)
    lens = np.zeros((Wn,), dtype=np.int32)
    for i, s in enumerate(seqs):
        char_idx_padded[i, :len(s)] = s
        lens[i] = len(s)

    out = char_bilstm_embed(jnp.asarray(char_idx_padded), jnp.asarray(lens), params)
    out = jax.block_until_ready(out)
    ref = reference(char_idx_padded, lens, params)
    np.testing.assert_allclose(np.asarray(out), ref, rtol=1e-4, atol=1e-4)
    assert out.shape == (Wn, 2 * H)

    # ---- test 2: varied lengths, multiple tiles (exercises sorting + zig-zag
    #      tile ordering + inverse permutation) ----
    rng = np.random.RandomState(0)
    Wn2 = 20
    lens2 = rng.randint(0, 13, size=Wn2).astype(np.int32)
    L2 = max(int(lens2.max()), 1)
    idx2 = np.zeros((Wn2, L2), dtype=np.int32)
    for i, n in enumerate(lens2):
        idx2[i, :n] = rng.randint(0, CHAR_VOCAB_SIZE, size=int(n))

    out2 = char_bilstm_embed(jnp.asarray(idx2), jnp.asarray(lens2), params, tw=8)
    out2 = jax.block_until_ready(out2)
    ref2 = reference(idx2, lens2, params)
    np.testing.assert_allclose(np.asarray(out2), ref2, rtol=5e-4, atol=5e-4)
    assert out2.shape == (Wn2, 2 * H)

    print("KERNEL_OK")
</pallas_src>

<mosaic_0001>
module attributes {stable_mosaic.version = 11 : i64} {
  func.func @bilstm_kernel(%arg0: i32, %arg1: memref<1xi32, #tpu.memory_space<smem>>, %arg2: memref<5x8x64xf32, #tpu.memory_space<vmem>>, %arg3: memref<8x1xi32, #tpu.memory_space<vmem>>, %arg4: memref<64x256xf32, #tpu.memory_space<vmem>>, %arg5: memref<64x256xf32, #tpu.memory_space<vmem>>, %arg6: memref<64x256xf32, #tpu.memory_space<vmem>>, %arg7: memref<64x256xf32, #tpu.memory_space<vmem>>, %arg8: memref<1x256xf32, #tpu.memory_space<vmem>>, %arg9: memref<1x256xf32, #tpu.memory_space<vmem>>, %arg10: memref<8x128xf32, #tpu.memory_space<vmem>>) attributes {dimension_semantics = [#tpu.dimension_semantics<parallel>], iteration_bounds = array<i64: 1>, scalar_prefetch = 1 : i64, scratch_operands = 0 : i64, tpu.core_type = #tpu.core_type<tc>, window_params = [{transform_indices = @transform_0, window_bounds = array<i64: 5, 8, 64>}, {transform_indices = @transform_1, window_bounds = array<i64: 8, 1>}, {pipeline_mode = #tpu.pipeline_mode<synchronous>, transform_indices = @transform_2, window_bounds = array<i64: 64, 256>}, {pipeline_mode = #tpu.pipeline_mode<synchronous>, transform_indices = @transform_3, window_bounds = array<i64: 64, 256>}, {pipeline_mode = #tpu.pipeline_mode<synchronous>, transform_indices = @transform_4, window_bounds = array<i64: 64, 256>}, {pipeline_mode = #tpu.pipeline_mode<synchronous>, transform_indices = @transform_5, window_bounds = array<i64: 64, 256>}, {pipeline_mode = #tpu.pipeline_mode<synchronous>, transform_indices = @transform_6, window_bounds = array<i64: 1, 256>}, {pipeline_mode = #tpu.pipeline_mode<synchronous>, transform_indices = @transform_7, window_bounds = array<i64: 1, 256>}, {transform_indices = @transform_8, window_bounds = array<i64: 8, 128>}]} {
    %c0 = arith.constant 0 : index
    %c0_0 = arith.constant 0 : index
    %0 = vector.load %arg3[%c0, %c0_0] : memref<8x1xi32, #tpu.memory_space<vmem>>, vector<8x1xi32>
    %1 = arith.index_cast %arg0 : i32 to index
    %2 = memref.load %arg1[%1] : memref<1xi32, #tpu.memory_space<smem>>
    %c0_1 = arith.constant 0 : index
    %c0_2 = arith.constant 0 : index
    %3 = vector.load %arg8[%c0_1, %c0_2] : memref<1x256xf32, #tpu.memory_space<vmem>>, vector<1x256xf32>
    %c0_3 = arith.constant 0 : index
    %c0_4 = arith.constant 0 : index
    %4 = vector.load %arg9[%c0_3, %c0_4] : memref<1x256xf32, #tpu.memory_space<vmem>>, vector<1x256xf32>
    %cst = arith.constant 0.000000e+00 : f32
    %5 = vector.broadcast %cst : f32 to vector<8x64xf32>
    %c0_i32 = arith.constant 0 : i32
    %6 = arith.subi %2, %c0_i32 : i32
    %7 = arith.addi %c0_i32, %6 : i32
    %c1_i32 = arith.constant 1 : i32
    %8:4 = scf.for %arg11 = %c0_i32 to %7 step %c1_i32 iter_args(%arg12 = %5, %arg13 = %5, %arg14 = %5, %arg15 = %5) -> (vector<8x64xf32>, vector<8x64xf32>, vector<8x64xf32>, vector<8x64xf32>)  : i32 {
      %c1_i32_7 = arith.constant 1 : i32
      %11 = arith.subi %2, %c1_i32_7 : i32
      %12 = arith.subi %11, %arg11 : i32
      %13 = arith.index_cast %arg11 : i32 to index
      %c0_8 = arith.constant 0 : index
      %c0_9 = arith.constant 0 : index
      %14 = vector.load %arg2[%13, %c0_8, %c0_9] : memref<5x8x64xf32, #tpu.memory_space<vmem>>, vector<1x8x64xf32>
      %15 = vector.shape_cast %14 : vector<1x8x64xf32> to vector<8x64xf32>
      %16 = arith.index_cast %12 : i32 to index
      %c0_10 = arith.constant 0 : index
      %c0_11 = arith.constant 0 : index
      %17 = vector.load %arg2[%16, %c0_10, %c0_11] : memref<5x8x64xf32, #tpu.memory_space<vmem>>, vector<1x8x64xf32>
      %18 = vector.shape_cast %17 : vector<1x8x64xf32> to vector<8x64xf32>
      %c0_12 = arith.constant 0 : index
      %c0_13 = arith.constant 0 : index
      %19 = vector.load %arg4[%c0_12, %c0_13] : memref<64x256xf32, #tpu.memory_space<vmem>>, vector<64x256xf32>
      %cst_14 = arith.constant dense<0.000000e+00> : vector<8x256xf32>
      %20 = tpu.matmul %15, %19, %cst_14 {dimension_numbers = #tpu.dot_dimension_numbers<[1], [0], [0], [1], [0, 0, 1, 1], [], []>} : vector<8x64xf32>, vector<64x256xf32>, vector<8x256xf32> -> vector<8x256xf32>
      %c0_15 = arith.constant 0 : index
      %c0_16 = arith.constant 0 : index
      %21 = vector.load %arg6[%c0_15, %c0_16] : memref<64x256xf32, #tpu.memory_space<vmem>>, vector<64x256xf32>
      %cst_17 = arith.constant dense<0.000000e+00> : vector<8x256xf32>
      %22 = tpu.matmul %arg12, %21, %cst_17 {dimension_numbers = #tpu.dot_dimension_numbers<[1], [0], [0], [1], [0, 0, 1, 1], [], []>} : vector<8x64xf32>, vector<64x256xf32>, vector<8x256xf32> -> vector<8x256xf32>
      %23 = arith.addf %20, %22 : vector<8x256xf32>
      %24 = vector.broadcast %3 : vector<1x256xf32> to vector<8x256xf32>
      %25 = arith.addf %23, %24 : vector<8x256xf32>
      %c0_18 = arith.constant 0 : index
      %c0_19 = arith.constant 0 : index
      %26 = vector.load %arg5[%c0_18, %c0_19] : memref<64x256xf32, #tpu.memory_space<vmem>>, vector<64x256xf32>
      %cst_20 = arith.constant dense<0.000000e+00> : vector<8x256xf32>
      %27 = tpu.matmul %18, %26, %cst_20 {dimension_numbers = #tpu.dot_dimension_numbers<[1], [0], [0], [1], [0, 0, 1, 1], [], []>} : vector<8x64xf32>, vector<64x256xf32>, vector<8x256xf32> -> vector<8x256xf32>
      %c0_21 = arith.constant 0 : index
      %c0_22 = arith.constant 0 : index
      %28 = vector.load %arg7[%c0_21, %c0_22] : memref<64x256xf32, #tpu.memory_space<vmem>>, vector<64x256xf32>
      %cst_23 = arith.constant dense<0.000000e+00> : vector<8x256xf32>
      %29 = tpu.matmul %arg14, %28, %cst_23 {dimension_numbers = #tpu.dot_dimension_numbers<[1], [0], [0], [1], [0, 0, 1, 1], [], []>} : vector<8x64xf32>, vector<64x256xf32>, vector<8x256xf32> -> vector<8x256xf32>
      %30 = arith.addf %27, %29 : vector<8x256xf32>
      %31 = vector.broadcast %4 : vector<1x256xf32> to vector<8x256xf32>
      %32 = arith.addf %30, %31 : vector<8x256xf32>
      %33 = vector.extract_strided_slice %25 {offsets = [0, 0], sizes = [8, 64], strides = [1, 1]} : vector<8x256xf32> to vector<8x64xf32>
      %cst_24 = arith.constant 5.000000e-01 : f32
      %34 = vector.broadcast %cst_24 : f32 to vector<8x64xf32>
      %35 = arith.mulf %34, %33 : vector<8x64xf32>
      %36 = math.tanh %35 : vector<8x64xf32>
      %cst_25 = arith.constant 5.000000e-01 : f32
      %37 = vector.broadcast %cst_25 : f32 to vector<8x64xf32>
      %38 = arith.mulf %37, %36 : vector<8x64xf32>
      %cst_26 = arith.constant 5.000000e-01 : f32
      %39 = vector.broadcast %cst_26 : f32 to vector<8x64xf32>
      %40 = arith.addf %38, %39 : vector<8x64xf32>
      %41 = vector.extract_strided_slice %25 {offsets = [0, 64], sizes = [8, 64], strides = [1, 1]} : vector<8x256xf32> to vector<8x64xf32>
      %cst_27 = arith.constant 5.000000e-01 : f32
      %42 = vector.broadcast %cst_27 : f32 to vector<8x64xf32>
      %43 = arith.mulf %42, %41 : vector<8x64xf32>
      %44 = math.tanh %43 : vector<8x64xf32>
      %cst_28 = arith.constant 5.000000e-01 : f32
      %45 = vector.broadcast %cst_28 : f32 to vector<8x64xf32>
      %46 = arith.mulf %45, %44 : vector<8x64xf32>
      %cst_29 = arith.constant 5.000000e-01 : f32
      %47 = vector.broadcast %cst_29 : f32 to vector<8x64xf32>
      %48 = arith.addf %46, %47 : vector<8x64xf32>
      %49 = vector.extract_strided_slice %25 {offsets = [0, 128], sizes = [8, 64], strides = [1, 1]} : vector<8x256xf32> to vector<8x64xf32>
      %50 = math.tanh %49 : vector<8x64xf32>
      %51 = vector.extract_strided_slice %25 {offsets = [0, 192], sizes = [8, 64], strides = [1, 1]} : vector<8x256xf32> to vector<8x64xf32>
      %cst_30 = arith.constant 5.000000e-01 : f32
      %52 = vector.broadcast %cst_30 : f32 to vector<8x64xf32>
      %53 = arith.mulf %52, %51 : vector<8x64xf32>
      %54 = math.tanh %53 : vector<8x64xf32>
      %cst_31 = arith.constant 5.000000e-01 : f32
      %55 = vector.broadcast %cst_31 : f32 to vector<8x64xf32>
      %56 = arith.mulf %55, %54 : vector<8x64xf32>
      %cst_32 = arith.constant 5.000000e-01 : f32
      %57 = vector.broadcast %cst_32 : f32 to vector<8x64xf32>
      %58 = arith.addf %56, %57 : vector<8x64xf32>
      %59 = arith.mulf %48, %arg13 : vector<8x64xf32>
      %60 = arith.mulf %40, %50 : vector<8x64xf32>
      %61 = arith.addf %59, %60 : vector<8x64xf32>
      %62 = math.tanh %61 : vector<8x64xf32>
      %63 = arith.mulf %58, %62 : vector<8x64xf32>
      %64 = vector.extract_strided_slice %32 {offsets = [0, 0], sizes = [8, 64], strides = [1, 1]} : vector<8x256xf32> to vector<8x64xf32>
      %cst_33 = arith.constant 5.000000e-01 : f32
      %65 = vector.broadcast %cst_33 : f32 to vector<8x64xf32>
      %66 = arith.mulf %65, %64 : vector<8x64xf32>
      %67 = math.tanh %66 : vector<8x64xf32>
      %cst_34 = arith.constant 5.000000e-01 : f32
      %68 = vector.broadcast %cst_34 : f32 to vector<8x64xf32>
      %69 = arith.mulf %68, %67 : vector<8x64xf32>
      %cst_35 = arith.constant 5.000000e-01 : f32
      %70 = vector.broadcast %cst_35 : f32 to vector<8x64xf32>
      %71 = arith.addf %69, %70 : vector<8x64xf32>
      %72 = vector.extract_strided_slice %32 {offsets = [0, 64], sizes = [8, 64], strides = [1, 1]} : vector<8x256xf32> to vector<8x64xf32>
      %cst_36 = arith.constant 5.000000e-01 : f32
      %73 = vector.broadcast %cst_36 : f32 to vector<8x64xf32>
      %74 = arith.mulf %73, %72 : vector<8x64xf32>
      %75 = math.tanh %74 : vector<8x64xf32>
      %cst_37 = arith.constant 5.000000e-01 : f32
      %76 = vector.broadcast %cst_37 : f32 to vector<8x64xf32>
      %77 = arith.mulf %76, %75 : vector<8x64xf32>
      %cst_38 = arith.constant 5.000000e-01 : f32
      %78 = vector.broadcast %cst_38 : f32 to vector<8x64xf32>
      %79 = arith.addf %77, %78 : vector<8x64xf32>
      %80 = vector.extract_strided_slice %32 {offsets = [0, 128], sizes = [8, 64], strides = [1, 1]} : vector<8x256xf32> to vector<8x64xf32>
      %81 = math.tanh %80 : vector<8x64xf32>
      %82 = vector.extract_strided_slice %32 {offsets = [0, 192], sizes = [8, 64], strides = [1, 1]} : vector<8x256xf32> to vector<8x64xf32>
      %cst_39 = arith.constant 5.000000e-01 : f32
      %83 = vector.broadcast %cst_39 : f32 to vector<8x64xf32>
      %84 = arith.mulf %83, %82 : vector<8x64xf32>
      %85 = math.tanh %84 : vector<8x64xf32>
      %cst_40 = arith.constant 5.000000e-01 : f32
      %86 = vector.broadcast %cst_40 : f32 to vector<8x64xf32>
      %87 = arith.mulf %86, %85 : vector<8x64xf32>
      %cst_41 = arith.constant 5.000000e-01 : f32
      %88 = vector.broadcast %cst_41 : f32 to vector<8x64xf32>
      %89 = arith.addf %87, %88 : vector<8x64xf32>
      %90 = arith.mulf %79, %arg15 : vector<8x64xf32>
      %91 = arith.mulf %71, %81 : vector<8x64xf32>
      %92 = arith.addf %90, %91 : vector<8x64xf32>
      %93 = math.tanh %92 : vector<8x64xf32>
      %94 = arith.mulf %89, %93 : vector<8x64xf32>
      %95 = vector.broadcast %arg11 : i32 to vector<8x1xi32>
      %96 = arith.cmpi slt, %95, %0 : vector<8x1xi32>
      %97 = vector.broadcast %12 : i32 to vector<8x1xi32>
      %98 = arith.cmpi slt, %97, %0 : vector<8x1xi32>
      %99 = vector.shape_cast %96 : vector<8x1xi1> to vector<8x1xi1>
      %100 = vector.broadcast %99 : vector<8x1xi1> to vector<8x64xi1>
      %101 = arith.select %100, %63, %arg12 : vector<8x64xi1>, vector<8x64xf32>
      %102 = vector.shape_cast %96 : vector<8x1xi1> to vector<8x1xi1>
      %103 = vector.broadcast %102 : vector<8x1xi1> to vector<8x64xi1>
      %104 = arith.select %103, %61, %arg13 : vector<8x64xi1>, vector<8x64xf32>
      %105 = vector.shape_cast %98 : vector<8x1xi1> to vector<8x1xi1>
      %106 = vector.broadcast %105 : vector<8x1xi1> to vector<8x64xi1>
      %107 = arith.select %106, %94, %arg14 : vector<8x64xi1>, vector<8x64xf32>
      %108 = vector.shape_cast %98 : vector<8x1xi1> to vector<8x1xi1>
      %109 = vector.broadcast %108 : vector<8x1xi1> to vector<8x64xi1>
      %110 = arith.select %109, %92, %arg15 : vector<8x64xi1>, vector<8x64xf32>
      scf.yield %101, %104, %107, %110 : vector<8x64xf32>, vector<8x64xf32>, vector<8x64xf32>, vector<8x64xf32>
    }
    %9 = tpu.concatenate %8#0, %8#2 in 1 : vector<8x64xf32>, vector<8x64xf32> -> vector<8x128xf32>
    %c0_5 = arith.constant 0 : index
    %c0_6 = arith.constant 0 : index
    %10 = vector.load %arg10[%c0_5, %c0_6] : memref<8x128xf32, #tpu.memory_space<vmem>>, vector<8x128xf32>
    tpu.vector_store %arg10[%c0_5, %c0_6], %9 {strides = array<i32>} : memref<8x128xf32, #tpu.memory_space<vmem>>, vector<8x128xf32>,
    return
  }
  func.func @transform_0(%arg0: i32, %arg1: memref<1xi32, #tpu.memory_space<smem>>) -> (i32, i32, i32) {
    %c0_i32 = arith.constant 0 : i32
    %c0_i32_0 = arith.constant 0 : i32
    %c0_i32_1 = arith.constant 0 : i32
    return %c0_i32, %arg0, %c0_i32_0 : i32, i32, i32
  }
  func.func @transform_1(%arg0: i32, %arg1: memref<1xi32, #tpu.memory_space<smem>>) -> (i32, i32) {
    %c0_i32 = arith.constant 0 : i32
    %c0_i32_0 = arith.constant 0 : i32
    return %arg0, %c0_i32 : i32, i32
  }
  func.func @transform_2(%arg0: i32, %arg1: memref<1xi32, #tpu.memory_space<smem>>) -> (i32, i32) {
    %c0_i32 = arith.constant 0 : i32
    %c0_i32_0 = arith.constant 0 : i32
    %c0_i32_1 = arith.constant 0 : i32
    return %c0_i32, %c0_i32_0 : i32, i32
  }
  func.func @transform_3(%arg0: i32, %arg1: memref<1xi32, #tpu.memory_space<smem>>) -> (i32, i32) {
    %c0_i32 = arith.constant 0 : i32
    %c0_i32_0 = arith.constant 0 : i32
    %c0_i32_1 = arith.constant 0 : i32
    return %c0_i32, %c0_i32_0 : i32, i32
  }
  func.func @transform_4(%arg0: i32, %arg1: memref<1xi32, #tpu.memory_space<smem>>) -> (i32, i32) {
    %c0_i32 = arith.constant 0 : i32
    %c0_i32_0 = arith.constant 0 : i32
    %c0_i32_1 = arith.constant 0 : i32
    return %c0_i32, %c0_i32_0 : i32, i32
  }
  func.func @transform_5(%arg0: i32, %arg1: memref<1xi32, #tpu.memory_space<smem>>) -> (i32, i32) {
    %c0_i32 = arith.constant 0 : i32
    %c0_i32_0 = arith.constant 0 : i32
    %c0_i32_1 = arith.constant 0 : i32
    return %c0_i32, %c0_i32_0 : i32, i32
  }
  func.func @transform_6(%arg0: i32, %arg1: memref<1xi32, #tpu.memory_space<smem>>) -> (i32, i32) {
    %c0_i32 = arith.constant 0 : i32
    %c0_i32_0 = arith.constant 0 : i32
    %c0_i32_1 = arith.constant 0 : i32
    return %c0_i32, %c0_i32_0 : i32, i32
  }
  func.func @transform_7(%arg0: i32, %arg1: memref<1xi32, #tpu.memory_space<smem>>) -> (i32, i32) {
    %c0_i32 = arith.constant 0 : i32
    %c0_i32_0 = arith.constant 0 : i32
    %c0_i32_1 = arith.constant 0 : i32
    return %c0_i32, %c0_i32_0 : i32, i32
  }
  func.func @transform_8(%arg0: i32, %arg1: memref<1xi32, #tpu.memory_space<smem>>) -> (i32, i32) {
    %c0_i32 = arith.constant 0 : i32
    %c0_i32_0 = arith.constant 0 : i32
    return %arg0, %c0_i32 : i32, i32
  }
}

</mosaic_0001>

<bundles_post_ra>
// kernel: tpu_custom_call.1
= control target key start
LH: loop header
LB: loop body
LE: loop exit
PB: predicated region body
PF: predicated region fallthrough
CT: control target
= control target key end

     0   :  { %15 = vsyncpa [#allocation5], 0  ;;  %s1225_s0 = inlined_call_operand.<no memory space> [shape: s32[1], index: 0, kind: input, shape index: {}]   ;;  %s1226_s1 = inlined_call_operand.hbm [shape: f32[5,8,64], index: 1, kind: input, shape index: {}]   ;;  %s1227_s2 = inlined_call_operand.vmem [shape: s32[8,1], index: 2, kind: input, shape index: {}]   ;;  %s1228_s3 = inlined_call_operand.hbm [shape: f32[64,256], index: 3, kind: input, shape index: {}]   ;;  %s1229_s4 = inlined_call_operand.hbm [shape: f32[64,256], index: 4, kind: input, shape index: {}]   ;;  %s1230_s5 = inlined_call_operand.hbm [shape: f32[64,256], index: 5, kind: input, shape index: {}]   ;;  %s1231_s6 = inlined_call_operand.hbm [shape: f32[64,256], index: 6, kind: input, shape index: {}]   ;;  %s1232_s7 = inlined_call_operand.vmem [shape: f32[1,256], index: 7, kind: input, shape index: {}]   ;;  %s1233_s8 = inlined_call_operand.vmem [shape: f32[1,256], index: 8, kind: input, shape index: {}]   ;;  %s1234_s9 = inlined_call_operand.hbm [shape: f32[8,128], index: 9, kind: output, shape index: {}]  }
   0x1   :  { %16 = vsyncpa [#allocation8], 0 }
   0x2   :  { %17 = vsyncpa [#allocation11], 0 }
   0x3   :  { %18 = vsyncpa [#allocation6], 0  ;;  %s972_s30 = smov [#allocation7]   ;;  %s776_s13 = scalar_lea.hbm %s1228_s3, 2048 }
   0x4   :  { %s38_s10 = sshll.u32 %s972_s30, 4  ;;  %p777_p0 = scmp.ne.s32.totalorder %s1228_s3, %s776_s13  ;;  %s39_s10 = int_to_ptr.vmem [resolvable:$true] %s38_s10 }
   0x5   :  { %p780_p1 = scmp.lt.u32.totalorder %s776_s13, %s1228_s3 }
   0x7   :  { %p782_p2 = pnand %p780_p1, %p777_p0 }
   0x9   :  { %785 = shalt.err (!%p782_p2)
}
   0xa   :  { %s786_s18 = scalar_lea.vmem %s39_s10, 2048  ;;  %p791_p4 = scmp.lt.s32.totalorder %s39_s10, %s39_s10 }
   0xb   :  { %p787_p3 = scmp.ne.s32.totalorder %s39_s10, %s786_s18  ;;  %p792_p5 = scmp.lt.s32.totalorder %s786_s18, %s786_s18 }
   0xd   :  { %p793_p6 = por %p792_p5, %p791_p4 }
   0xf   :  { %p794_p7 = pnand %p793_p6, %p787_p3 }
  0x11   :  { %797 = shalt.err (!%p794_p7)
}
  0x12   :  { %s973_s19 = smov 256   ;;  %s974_s20 = smov 16  }
  0x13   :  { %44 = dma.hbm_to_vmem [thread:$0]  %s1228_s3, 2048, %s39_s10, [#allocation8], %s973_s19, %s973_s19, %s974_s20  }
  0x14   :  { %s975_s23 = smov [#allocation10]   ;;  %s976_s25 = smov [#allocation4]  }
  0x15   :  { %s62_s24 = sshll.u32 %s975_s23, 4  ;;  %s24_s26 = sshll.u32 %s976_s25, 4  ;;  %s63_s24 = int_to_ptr.vmem [resolvable:$true] %s62_s24  ;;  %s25_s26 = int_to_ptr.vmem [resolvable:$true] %s24_s26 }
  0x16   :  { %s798_s29 = scalar_lea.hbm %s1230_s5, 2048 }
  0x17   :  { %p799_p8 = scmp.ne.s32.totalorder %s1230_s5, %s798_s29  ;;  %p802_p9 = scmp.lt.u32.totalorder %s798_s29, %s1230_s5 }
  0x19   :  { %p804_p10 = pnand %p802_p9, %p799_p8 }
  0x1b   :  { %807 = shalt.err (!%p804_p10)
}
  0x1c   :  { %s808_s3 = scalar_lea.vmem %s63_s24, 2048  ;;  %p813_p12 = scmp.lt.s32.totalorder %s63_s24, %s63_s24 }
  0x1d   :  { %p809_p11 = scmp.ne.s32.totalorder %s63_s24, %s808_s3  ;;  %p814_p13 = scmp.lt.s32.totalorder %s808_s3, %s808_s3 }
  0x1f   :  { %p815_p0 = por %p814_p13, %p813_p12 }
  0x21   :  { %p816_p1 = pnand %p815_p0, %p809_p11 }
  0x23   :  { %819 = shalt.err (!%p816_p1)
}
  0x24   :  { %68 = dma.hbm_to_vmem [thread:$0]  %s1230_s5, 2048, %s63_s24, [#allocation11], %s973_s19, %s973_s19, %s974_s20  }
  0x25   :  { %s820_s17 = scalar_lea.hbm %s1226_s1, 640 }
  0x26   :  { %p821_p2 = scmp.ne.s32.totalorder %s1226_s1, %s820_s17  ;;  %p824_p3 = scmp.lt.u32.totalorder %s820_s17, %s1226_s1 }
  0x28   :  { %p826_p4 = pnand %p824_p3, %p821_p2 }
  0x2a   :  { %829 = shalt.err (!%p826_p4)
}
  0x2b   :  { %s830_s25 = scalar_lea.vmem %s25_s26, 640  ;;  %p835_p6 = scmp.lt.s32.totalorder %s25_s26, %s25_s26 }
  0x2c   :  { %p831_p5 = scmp.ne.s32.totalorder %s25_s26, %s830_s25  ;;  %p836_p7 = scmp.lt.s32.totalorder %s830_s25, %s830_s25 }
  0x2e   :  { %p837_p8 = por %p836_p7, %p835_p6 }
  0x30   :  { %p838_p9 = pnand %p837_p8, %p831_p5 }
  0x32   :  { %841 = shalt.err (!%p838_p9)
}
  0x33   :  { %s977_s5 = smov 128   ;;  %s978_s24 = smov 8  }
  0x34   :  { %30 = dma.hbm_to_vmem [thread:$0]  %s1226_s1, 640, %s25_s26, [#allocation5], %s977_s5, %s977_s5, %s978_s24  }
  0x35   :  { %s979_s29 = smov [#allocation9]   ;;  %s980_s11 = smov [#allocation12]  }
  0x36   :  { %s50_s30 = sshll.u32 %s979_s29, 4  ;;  %s74_s12 = sshll.u32 %s980_s11, 4  ;;  %s51_s30 = int_to_ptr.vmem [resolvable:$true] %s50_s30  ;;  %s75_s12 = int_to_ptr.vmem [resolvable:$true] %s74_s12 }
  0x37   :  { %s842_s10 = scalar_lea.hbm %s1229_s4, 2048 }
  0x38   :  { %p843_p10 = scmp.ne.s32.totalorder %s1229_s4, %s842_s10  ;;  %p846_p11 = scmp.lt.u32.totalorder %s842_s10, %s1229_s4 }
  0x3a   :  { %p848_p12 = pnand %p846_p11, %p843_p10 }
  0x3c   :  { %851 = shalt.err (!%p848_p12)
}
  0x3d   :  { %s852_s1 = scalar_lea.vmem %s51_s30, 2048  ;;  %p857_p0 = scmp.lt.s32.totalorder %s51_s30, %s51_s30 }
  0x3e   :  { %p853_p13 = scmp.ne.s32.totalorder %s51_s30, %s852_s1  ;;  %p858_p1 = scmp.lt.s32.totalorder %s852_s1, %s852_s1 }
  0x40   :  { %p859_p2 = por %p858_p1, %p857_p0 }
  0x42   :  { %p860_p3 = pnand %p859_p2, %p853_p13 }
  0x44   :  { %863 = shalt.err (!%p860_p3)
}
  0x45   :  { %56 = dma.hbm_to_vmem [thread:$0]  %s1229_s4, 2048, %s51_s30, [#allocation8], %s973_s19, %s973_s19, %s974_s20  }
  0x46   :  { %s864_s23 = scalar_lea.hbm %s1231_s6, 2048 }
  0x47   :  { %p865_p4 = scmp.ne.s32.totalorder %s1231_s6, %s864_s23  ;;  %p868_p5 = scmp.lt.u32.totalorder %s864_s23, %s1231_s6 }
  0x49   :  { %p870_p6 = pnand %p868_p5, %p865_p4 }
  0x4b   :  { %873 = shalt.err (!%p870_p6)
}
  0x4c   :  { %s874_s28 = scalar_lea.vmem %s75_s12, 2048  ;;  %p879_p8 = scmp.lt.s32.totalorder %s75_s12, %s75_s12 }
  0x4d   :  { %p875_p7 = scmp.ne.s32.totalorder %s75_s12, %s874_s28  ;;  %p880_p9 = scmp.lt.s32.totalorder %s874_s28, %s874_s28 }
  0x4f   :  { %p881_p10 = por %p880_p9, %p879_p8 }
  0x51   :  { %p882_p11 = pnand %p881_p10, %p875_p7 }
  0x53   :  { %885 = shalt.err (!%p882_p11)
}
  0x54   :  { %80 = dma.hbm_to_vmem [thread:$0]  %s1231_s6, 2048, %s75_s12, [#allocation11], %s973_s19, %s973_s19, %s974_s20  }
  0x55   :  { %936 = dma.done.wait [#allocation5], 640  }
  0x56   :  { %937 = vsyncadd [#allocation5], 4294966656 }
  0x57   :  { %938 = dma.done.wait [#allocation8], 4096  }
  0x58   :  { %939 = vsyncadd [#allocation8], 4294963200 }
  0x59   :  { %940 = dma.done.wait [#allocation11], 4096  }
  0x5a   :  { %941 = vsyncadd [#allocation11], 4294963200  ;;  %v1111_v0 = vld [vmem:[%s1227_s2] sm:$0xff]  ;;  %p612_p12 = scmp.le.s32.totalorder %s1225_s0, 0  ;;  %v1126_v3 = vmov 0.0   ;;  %v1128_v4 = vmov 0.0  }
  0x5b   :  { %v1116_v1 = vld [vmem:[%s1232_s7] sm:$0x3]  ;;  %v1130_v5 = vmov (!%p612_p12), 0.0   ;;  %v1132_v6 = vmov (!%p612_p12), 0.0   ;;  %v1134_v7 = vmov (!%p612_p12), 0.0   ;;  %v1136_v8 = vmov (!%p612_p12), 0.0  }
  0x5c   :  { %v1121_v2 = vld [vmem:[%s1233_s8] sm:$0x3]  ;;  %601 = sbr.rel (%p612_p12) target bundleno = 604 (0x25c), region = 75  ;;  %s1138_s2 = smov (!%p612_p12), 0  }
  0x63 LB: > { %v139_v9 = vld [vmem:[#allocation10 + $0x8] sm:$0xff]  ;;  %v141_v10 = vld [vmem:[#allocation10 + $0x18] sm:$0xff]  ;;  %v138_v11 = vld [vmem:[#allocation10] sm:$0xff]  ;;  %v981_v16 = vmov 0.0   ;;  %s982_s7 = smov 64   ;;  %vm157_vm0 = vcmask 523264   ;;  %s962_s2 = sphi %s1138_s2, %s107_s2   ;;  %v958_v8 = vphi %v1136_v8, %v1236_v8   ;;  %v954_v7 = vphi %v1134_v7, %v559_v7   ;;  %v950_v6 = vphi %v1132_v6, %v1235_v6   ;;  %v946_v5 = vphi %v1130_v5, %v566_v5  }
  0x64   : > { %v620_v12 = vpack.c.bf16 %v141_v10, %v139_v9  ;;  %v140_v13 = vld [vmem:[#allocation10 + $0x10] sm:$0xff]  ;;  %v143_v14 = vld [vmem:[#allocation10 + $0x28] sm:$0xff]  ;;  %v145_v15 = vld [vmem:[#allocation10 + $0x38] sm:$0xff]  ;;  %224 = vmatprep.mubr.f32.mxu0 %v981_v16  ;;  %419 = vmatprep.mubr.f32.mxu1 %v981_v16  ;;  %s613_s12 = sadd.s32 4294967295, %s1225_s0  ;;  %s614_s15 = sshll.u32 %s962_s2, 3 }
  0x65   : > { %155 = vrot.lane.b32.xlu0 %v958_v8, %s982_s7  ;;  %v622_v17 = vpack.c.bf16 %v140_v13, %v138_v11  ;;  %v624_v18 = vpack.c.bf16 %v145_v15, %v143_v14  ;;  %v335_v19 = vld [vmem:[#allocation12 + $0x8] sm:$0xff]  ;;  %v337_v20 = vld [vmem:[#allocation12 + $0x18] sm:$0xff]  ;;  %v142_v21 = vld [vmem:[#allocation10 + $0x20] sm:$0xff]  ;;  %s1170_s16 = ssub.s32 %s613_s12, %s962_s2  ;;  %s117_s1 = scalar_lea.vmem [#allocation4], %s614_s15 }
  0x66   : > { %621 = vmatprep.subr.bf16.mxu0 %v620_v12  ;;  %v652_v22 = vpack.c.bf16 %v337_v20, %v335_v19  ;;  %v144_v23 = vld [vmem:[#allocation10 + $0x30] sm:$0xff]  ;;  %v334_v24 = vld [vmem:[#allocation12] sm:$0xff]  ;;  %v147_v28 = vld [vmem:[#allocation10 + $0x48] sm:$0xff]  ;;  %s615_s17 = sshll.u32 %s1170_s16, 3 }
  0x67   : > { %v336_v25 = vld [vmem:[#allocation12 + $0x10] sm:$0xff]  ;;  %623 = vmatpush1.bf16.msra.mxu0 %v622_v17  ;;  %v626_v26 = vpack.c.bf16 %v144_v23, %v142_v21  ;;  %v149_v29 = vld [vmem:[#allocation10 + $0x58] sm:$0xff]  ;;  %v339_v30 = vld [vmem:[#allocation12 + $0x28] sm:$0xff]  ;;  %s120_s26 = scalar_lea.vmem [#allocation4], %s615_s17 }
  0x68   : > { %v654_v27 = vpack.c.bf16 %v336_v25, %v334_v24  ;;  %625 = vmatprep.subr.bf16.mxu0 %v624_v18  ;;  %653 = vmatprep.subr.bf16.mxu1 %v652_v22  ;;  %v628_v31 = vpack.c.bf16 %v149_v29, %v147_v28  ;;  %v341_v32 = vld [vmem:[#allocation12 + $0x38] sm:$0xff]  ;;  %v146_v33 = vld [vmem:[#allocation10 + $0x40] sm:$0xff]  ;;  %v148_v34 = vld [vmem:[#allocation10 + $0x50] sm:$0xff] }
  0x69   : > { %351 = vrot.lane.b32.xlu0 %v950_v6, %s982_s7  ;;  %v656_v35 = vpack.c.bf16 %v341_v32, %v339_v30  ;;  %v338_v36 = vld [vmem:[#allocation12 + $0x20] sm:$0xff]  ;;  %v340_v37 = vld [vmem:[#allocation12 + $0x30] sm:$0xff]  ;;  %v151_v38 = vld [vmem:[#allocation10 + $0x68] sm:$0xff]  ;;  %v630_v43 = vpack.c.bf16 %v148_v34, %v146_v33 }
  0x6a   : > { %655 = vmatpush1.bf16.msra.mxu1 %v654_v27  ;;  %v658_v39 = vpack.c.bf16 %v340_v37, %v338_v36  ;;  %v153_v40 = vld [vmem:[#allocation10 + $0x78] sm:$0xff]  ;;  %v343_v41 = vld [vmem:[#allocation12 + $0x48] sm:$0xff]  ;;  %v150_v45 = vld [vmem:[#allocation10 + $0x60] sm:$0xff] }
  0x6b   : > { %v345_v42 = vld [vmem:[#allocation12 + $0x58] sm:$0xff]  ;;  %627 = vmatpush1.bf16.msra.mxu0 %v626_v26  ;;  %657 = vmatprep.subr.bf16.mxu1 %v656_v35  ;;  %v342_v46 = vld [vmem:[#allocation12 + $0x40] sm:$0xff]  ;;  %v632_v47 = vpack.c.bf16 %v153_v40, %v151_v38  ;;  %v152_v48 = vld [vmem:[#allocation10 + $0x70] sm:$0xff] }
  0x6c   : > { %v660_v44 = vpack.c.bf16 %v345_v42, %v343_v41  ;;  %629 = vmatprep.subr.bf16.mxu0 %v628_v31  ;;  %v344_v49 = vld [vmem:[#allocation12 + $0x50] sm:$0xff]  ;;  %v123_v50 = vld [vmem:[#allocation7 + $0x8] sm:$0xff]  ;;  %v125_v52 = vld [vmem:[#allocation7 + $0x18] sm:$0xff]  ;;  %v634_v58 = vpack.c.bf16 %v152_v48, %v150_v45 }
  0x6d   : > { %v662_v51 = vpack.c.bf16 %v344_v49, %v342_v46  ;;  %v347_v53 = vld [vmem:[#allocation12 + $0x68] sm:$0xff]  ;;  %v349_v54 = vld [vmem:[#allocation12 + $0x78] sm:$0xff]  ;;  %v346_v56 = vld [vmem:[#allocation12 + $0x60] sm:$0xff]  ;;  %v636_v60 = vpack.c.bf16 %v125_v52, %v123_v50 }
  0x6e   : > { %659 = vmatpush1.bf16.msra.mxu1 %v658_v39  ;;  %v664_v55 = vpack.c.bf16 %v349_v54, %v347_v53  ;;  %v348_v57 = vld [vmem:[#allocation12 + $0x70] sm:$0xff]  ;;  %v319_v59 = vld [vmem:[#allocation9 + $0x8] sm:$0xff]  ;;  %v321_v61 = vld [vmem:[#allocation9 + $0x18] sm:$0xff]  ;;  %v549_v53 = vstv %s962_s2  ;;  %v983_v54 = vmov 0   ;;  %s107_s2 = sadd.s32 1, %s962_s2  }
  0x6f   : > { %661 = vmatprep.subr.bf16.mxu1 %v660_v44  ;;  %631 = vmatpush1.bf16.msra.mxu0 %v630_v43  ;;  %v666_v62 = vpack.c.bf16 %v348_v57, %v346_v56  ;;  %v668_v63 = vpack.c.bf16 %v321_v61, %v319_v59  ;;  %v122_v3 = vld [vmem:[#allocation7] sm:$0xff]  ;;  %v124_v4 = vld [vmem:[#allocation7 + $0x10] sm:$0xff]  ;;  %v127_v9 = vld [vmem:[#allocation7 + $0x28] sm:$0xff]  ;;  %vm550_vm1 = vcmp.lt.s32.totalorder %v549_v53, %v1111_v0  ;;  %v306_v56 = vlaneseq  ;;  %p106_p13 = scmp.ge.s32.totalorder %s107_s2, %s1225_s0 }
  0x70   : > { %633 = vmatprep.subr.bf16.mxu0 %v632_v47  ;;  %v129_v10 = vld [vmem:[#allocation7 + $0x38] sm:$0xff]  ;;  %v638_v11 = vpack.c.bf16 %v124_v4, %v122_v3  ;;  %v126_v12 = vld [vmem:[#allocation7 + $0x20] sm:$0xff]  ;;  %v128_v13 = vld [vmem:[#allocation7 + $0x30] sm:$0xff]  ;;  %758 = vset.pattern.permute.xlu0 %v983_v54 }
  0x71   : > { %v640_v14 = vpack.c.bf16 %v129_v10, %v127_v9  ;;  %v318_v15 = vld [vmem:[#allocation9] sm:$0xff]  ;;  %v320_v17 = vld [vmem:[#allocation9 + $0x10] sm:$0xff]  ;;  %v131_v18 = vld [vmem:[#allocation7 + $0x48] sm:$0xff]  ;;  %v642_v23 = vpack.c.bf16 %v128_v13, %v126_v12  ;;  %759 = vset.pattern.permute.xlu1 %v983_v54  ;;  %v307_v57 = vshrl.u32 %v306_v56, 7 }
  0x72   : > { %663 = vmatpush1.bf16.msra.mxu1 %v662_v51  ;;  %v133_v20 = vld [vmem:[#allocation7 + $0x58] sm:$0xff]  ;;  %v323_v21 = vld [vmem:[#allocation9 + $0x28] sm:$0xff]  ;;  %v670_v24 = vpack.c.bf16 %v320_v17, %v318_v15  ;;  %v130_v25 = vld [vmem:[#allocation7 + $0x40] sm:$0xff] }
  0x73   : > { %665 = vmatprep.subr.bf16.mxu1 %v664_v55  ;;  %635 = vmatpush1.bf16.msra.mxu0 %v634_v58  ;;  %v325_v22 = vld [vmem:[#allocation9 + $0x38] sm:$0xff]  ;;  %v132_v26 = vld [vmem:[#allocation7 + $0x50] sm:$0xff]  ;;  %v644_v27 = vpack.c.bf16 %v133_v20, %v131_v18  ;;  %v322_v29 = vld [vmem:[#allocation9 + $0x20] sm:$0xff]  ;;  %v553_v55 = vsel %vm550_vm1, 1, %v983_v54  ;;  %v308_v58 = vsub.s32 0, %v307_v57  ;;  %v312_v59 = vsub.s32 1, %v307_v57 }
  0x74   : > { %637 = vmatprep.subr.bf16.mxu0 %v636_v60  ;;  %v672_v28 = vpack.c.bf16 %v325_v22, %v323_v21  ;;  %v324_v30 = vld [vmem:[#allocation9 + $0x30] sm:$0xff]  ;;  %v135_v31 = vld [vmem:[#allocation7 + $0x68] sm:$0xff]  ;;  %v137_v33 = vld [vmem:[#allocation7 + $0x78] sm:$0xff]  ;;  %v646_v36 = vpack.c.bf16 %v132_v26, %v130_v25  ;;  %555 = vperm.xlu0 %758, %v553_v55   ;;  %v551_v25 = vstv %s1170_s16 }
  0x75   : > { %v327_v34 = vld [vmem:[#allocation9 + $0x48] sm:$0xff]  ;;  %v329_v35 = vld [vmem:[#allocation9 + $0x58] sm:$0xff]  ;;  %v674_v37 = vpack.c.bf16 %v324_v30, %v322_v29  ;;  %v134_v38 = vld [vmem:[#allocation7 + $0x60] sm:$0xff]  ;;  %v648_v39 = vpack.c.bf16 %v137_v33, %v135_v31  ;;  %v309_v60 = vrot.slane %v1116_v1, %v308_v58  ;;  %v504_v4 = vrot.slane %v1121_v2, %v308_v58 }
  0x76   : > { %667 = vmatpush1.bf16.msra.mxu1 %v666_v62  ;;  %v676_v40 = vpack.c.bf16 %v329_v35, %v327_v34  ;;  %v136_v41 = vld [vmem:[#allocation7 + $0x70] sm:$0xff]  ;;  %v326_v42 = vld [vmem:[#allocation9 + $0x40] sm:$0xff]  ;;  %v331_v44 = vld [vmem:[#allocation9 + $0x68] sm:$0xff]  ;;  %v313_v62 = vrot.slane %v1116_v1, %v312_v59  ;;  %vm552_vm2 = vcmp.lt.s32.totalorder %v551_v25, %v1111_v0 }
  0x77   : > { %669 = vmatprep.subr.bf16.mxu1 %v668_v63  ;;  %v328_v43 = vld [vmem:[#allocation9 + $0x50] sm:$0xff]  ;;  %v333_v45 = vld [vmem:[#allocation9 + $0x78] sm:$0xff]  ;;  %v650_v46 = vpack.c.bf16 %v136_v41, %v134_v38  ;;  %v330_v49 = vld [vmem:[#allocation9 + $0x60] sm:$0xff]  ;;  %v560_v29 = vsel %vm552_vm2, 1, %v983_v54 }
  0x78   : > { %v678_v47 = vpack.c.bf16 %v328_v43, %v326_v42  ;;  %v680_v48 = vpack.c.bf16 %v333_v45, %v331_v44  ;;  %v332_v50 = vld [vmem:[#allocation9 + $0x70] sm:$0xff]  ;;  %v118_v51 = vld [vmem:[%s117_s1] sm:$0xff] }
  0x79   : > { %v682_v52 = vpack.c.bf16 %v332_v50, %v330_v49 }
  0xd7   : > { %v156_v19 = vpop.permute.xlu0 %155 }
  0xd8   : > { %616 = vmatmul.mubr.msk.f32.vlgmr.msra.gmra.mrb[0].mxu0 %vm157_vm0, %v156_v19 }
  0xd9   : > { %639 = vmatpush1.bf16.msra.mxu0 %v638_v11  ;;  %298 = vmatprep.mubr.f32.mxu0 %v981_v16 }
  0xda   : > { %641 = vmatprep.subr.bf16.mxu0 %v640_v14  ;;  %v508_v14 = vrot.slane %v1121_v2, %v312_v59 }
  0xdb   : > { %v352_v32 = vpop.permute.xlu0 %351 }
  0xdc   : > { %618 = vmatmul.mubr.msk.f32.vlgmr.msra.gmra.mrb[0].mxu1 %vm157_vm0, %v352_v32 }
  0xdd   : > { %643 = vmatpush1.bf16.msra.mxu0 %v642_v23  ;;  %671 = vmatpush1.bf16.msra.mxu1 %v670_v24 }
  0xde   : > { %645 = vmatprep.subr.bf16.mxu0 %v644_v27  ;;  %673 = vmatprep.subr.bf16.mxu1 %v672_v28 }
  0xdf   : > { %493 = vmatprep.mubr.f32.mxu1 %v981_v16  ;;  %v121_v16 = vld [vmem:[%s120_s26] sm:$0xff] }
  0xe1   : > { %647 = vmatpush1.bf16.msra.mxu0 %v646_v36  ;;  %675 = vmatpush1.bf16.msra.mxu1 %v674_v37 }
  0xe2   : > { %649 = vmatprep.subr.bf16.mxu0 %v648_v39  ;;  %677 = vmatprep.subr.bf16.mxu1 %v676_v40 }
  0xe5   : > { %651 = vmatpush1.bf16.msra.mxu0 %v650_v46  ;;  %679 = vmatpush1.bf16.msra.mxu1 %v678_v47 }
  0xe6   : > { %681 = vmatprep.subr.bf16.mxu1 %v680_v48 }
  0xe8   : > { %617 = vmatmul.mubr.msk.f32.vlgmr.msra.gmra.mrb[0].mxu0 %vm157_vm0, %v118_v51 }
  0xe9   : > { %683 = vmatpush1.bf16.msra.mxu1 %v682_v52 }
  0xec   : > { %619 = vmatmul.mubr.msk.f32.vlgmr.msra.gmra.mrb[0].mxu1 %vm157_vm0, %v121_v16 }
  0xf3   : > { %v556_v32 = vpop.permute.xlu0 %555 }
  0xf4   : > { %vm557_vm3 = vcmp.eq.s32.totalorder %v556_v32, 1 }
 0x1bb   : > { %v300_v61 = vpop.f32.mrb[0].mxu0 }
 0x1bc   : > { %v316_v63 = vadd.f32 %v309_v60, %v300_v61  ;;  %v302_v3 = vpop.f32.mrb[1].mxu0 }
 0x1bd   : > { %v317_v10 = vadd.f32 %v313_v62, %v302_v3 }
 0x1be   : > { %v513_v9 = vmul.f32 0.5, %v316_v63 }
 0x1bf   : > { %v495_v11 = vpop.f32.mrb[0].mxu1  ;;  %v518_v30 = vmul.f32 0.5, %v317_v10 }
 0x1c0   : > { %760 = vtanh.f32 %v513_v9  ;;  %v511_v12 = vadd.f32 %v504_v4, %v495_v11  ;;  %v497_v13 = vpop.f32.mrb[1].mxu1 }
 0x1c1   : > { %762 = vtanh.f32 %v317_v10  ;;  %v512_v17 = vadd.f32 %v508_v14, %v497_v13 }
 0x1c2   : > { %v531_v15 = vmul.f32 0.5, %v511_v12 }
 0x1c3   : > { %v536_v31 = vmul.f32 0.5, %v512_v17 }
 0x1c4   : > { %764 = vtanh.f32 %v531_v15 }
 0x1c5   : > { %766 = vtanh.f32 %v512_v17 }
 0x1c6   : > { %768 = vtanh.f32 %v518_v30 }
 0x1c7   : > { %770 = vtanh.f32 %v536_v31 }
 0x1ca   : > { %v761_v18 = vpop.eup %760 }
 0x1cb   : > { %v515_v19 = vmul.f32 0.5, %v761_v18  ;;  %v763_v20 = vpop.eup %762 }
 0x1cd   : > { %v516_v21 = vadd.f32 0.5, %v515_v19 }
 0x1ce   : > { %v765_v22 = vpop.eup %764 }
 0x1cf   : > { %v533_v23 = vmul.f32 0.5, %v765_v22  ;;  %v523_v24 = vmul.f32 %v763_v20, %v516_v21  ;;  %v767_v27 = vpop.eup %766  ;;  %v522_v33 = vmul.f32 %v954_v7, %v516_v21 }
 0x1d0   : > { %v769_v38 = vpop.eup %768 }
 0x1d1   : > { %v534_v26 = vadd.f32 0.5, %v533_v23  ;;  %525 = vrot.lane.b32.xlu1 %v523_v24, %s982_s7  ;;  %v520_v40 = vmul.f32 0.5, %v769_v38  ;;  %v771_v41 = vpop.eup %770 }
 0x1d2   : > { %v538_v43 = vmul.f32 0.5, %v771_v41 }
 0x1d3   : > { %v541_v28 = vmul.f32 %v767_v27, %v534_v26  ;;  %v540_v36 = vmul.f32 %v946_v5, %v534_v26  ;;  %v521_v42 = vadd.f32 0.5, %v520_v40 }
 0x1d4   : > { %v539_v46 = vadd.f32 0.5, %v538_v43 }
 0x1d5   : > { %543 = vrot.lane.b32.xlu1 %v541_v28, %s982_s7 }
 0x1d9   : > { %562 = vperm.xlu1 %759, %v560_v29  }
 0x243   : > { %v526_v34 = vpop.permute.xlu1 %525 }
 0x244   : > { %v528_v35 = vadd.f32 %v526_v34, %v522_v33 }
 0x246   : > { %772 = vtanh.f32 %v528_v35  ;;  %v559_v7 = vsel %vm557_vm3, %v528_v35, %v954_v7  }
 0x247   : > { %v544_v37 = vpop.permute.xlu1 %543 }
 0x248   : > { %v546_v39 = vadd.f32 %v544_v37, %v540_v36 }
 0x24a   : > { %774 = vtanh.f32 %v546_v39 }
 0x250   : > { %v773_v44 = vpop.eup %772 }
 0x251   : > { %v530_v45 = vmul.f32 %v773_v44, %v521_v42 }
 0x253   : > { %v558_v47 = vsel %vm557_vm3, %v530_v45, %v958_v8  }
 0x254   : > { %v775_v48 = vpop.eup %774  ;;  %v1236_v8 = vmov %v558_v47  ;;  %v1238_v4 = vmov (%p106_p13), %v558_v47 }
 0x255   : > { %v548_v49 = vmul.f32 %v775_v48, %v539_v46  ;;  %109 = sbr.rel (!%p106_p13) target bundleno = 99 (0x63), region = 81 }
 0x258   : > { %v563_v50 = vpop.permute.xlu1 %562 }
 0x259   : > { %vm564_vm4 = vcmp.eq.s32.totalorder %v563_v50, 1 }
 0x25a   : > { %v565_v51 = vsel %vm564_vm4, %v548_v49, %v950_v6   ;;  %v566_v5 = vsel %vm564_vm4, %v546_v39, %v946_v5  }
 0x25b   : > { %v1235_v6 = vmov %v565_v51  ;;  %v1237_v3 = vmov (%p106_p13), %v565_v51 }
 0x25c PF:  { %s984_s22 = smov 64   ;;  %s985_s23 = smov [#allocation13]   ;;  %vm571_vm5 = vcmask 523264   ;;  %v970_v4 = vphi %v1128_v4, %v1238_v4   ;;  %v966_v3 = vphi %v1126_v3, %v1237_v3  }
 0x25d   :  { %568 = vrot.lane.b32.xlu0 %v970_v4, %s984_s22  ;;  %s580_s25 = sshll.u32 %s985_s23, 4  ;;  %s581_s25 = int_to_ptr.vmem [resolvable:$true] %s580_s25 }
 0x25e   :  { %s886_s5 = scalar_lea.vmem %s581_s25, 128  ;;  %p891_p1 = scmp.lt.s32.totalorder %s581_s25, %s581_s25 }
 0x25f   :  { %p887_p0 = scmp.ne.s32.totalorder %s581_s25, %s886_s5  ;;  %p892_p2 = scmp.lt.s32.totalorder %s886_s5, %s886_s5 }
 0x261   :  { %p893_p3 = por %p892_p2, %p891_p1 }
 0x263   :  { %p894_p4 = pnand %p893_p3, %p887_p0 }
 0x2cf   :  { %v569_v8 = vpop.permute.xlu0 %568 }
 0x2d0   :  { %v572_v52 = vsel %vm571_vm5, %v569_v8, %v966_v3 }
 0x2d1   :  { %573 = vst [vmem:[#allocation13] sm:$0xff] %v572_v52 }
 0x2d2   :  { %897 = shalt.err (!%p894_p4)
}
 0x2d3   :  { %s898_s27 = scalar_lea.hbm %s1234_s9, 128 }
 0x2d4   :  { %p899_p5 = scmp.ne.s32.totalorder %s1234_s9, %s898_s27  ;;  %p902_p6 = scmp.lt.u32.totalorder %s898_s27, %s1234_s9 }
 0x2d6   :  { %p904_p7 = pnand %p902_p6, %p899_p5 }
 0x2d8   :  { %907 = shalt.err (!%p904_p7)
}
 0x2d9   :  { %583 = dma.vmem_to_hbm [thread:$0]  %s581_s25, 128, %s1234_s9, [#allocation6]  }
 0x2da   :  { %942 = dma.done.wait [#allocation6], 128  }
 0x2db   :  { %943 = vsyncadd [#allocation6], 4294967168 }
 0x2dc   :  { %587 = vsyncpa [#allocation5], 1 }
 0x2dd   :  { %588 = vsyncpa [#allocation8], 1 }
 0x2de   :  { %589 = vsyncpa [#allocation11], 1 }
 0x2df   :  { %590 = vsyncpa [#allocation6], 1 }

</bundles_post_ra>
